<compile_context>
chip_gen: v5e
topology: v5e:2x2
jax: 0.10.0
libtpu: 0.0.40
codegen_flags: <defaults>
</compile_context>

<pallas_src>
from functools import partial

import jax
import jax.numpy as jnp
from jax.experimental import pallas as pl
from jax.experimental.pallas import tpu as pltpu

ALPHA = 0.25
GAMMA = 2  # fixed at 2 -> explicit square below (module default)


def _round_up(x, m):
    return ((x + m - 1) // m) * m


def _device_defaults(num_classes):
    kind = ""
    try:
        kind = jax.devices()[0].device_kind.lower()
    except Exception:
        pass
    is_v7 = ("v7" in kind) or ("7x" in kind)
    # v7x has 2 TensorCores per chip; v5e/v6e have 1 (extra core axis there
    # only adds per-step overhead and shrinks tiles for small N).
    num_cores = 2 if is_v7 else 1
    # ~1 MiB of f32 logits per block so per-step HBM time comfortably exceeds
    # the ~0.35 us fixed pipeline overhead on every generation.
    tile_n = max(128, ((1 << 20) // (num_classes * 4)) // 128 * 128)
    # Input windows are lane-padded to 128 in VMEM (C=16 -> 8x logical bytes),
    # so raise the scoped VMEM limit; keep below v7x's 64 MiB physical.
    vmem_limit = (48 if is_v7 else 64) * 1024 * 1024
    return num_cores, tile_n, vmem_limit


def focal_loss_kernel(logits_ref, targets_ref, out_ref, acc_ref, *, n_valid):
    # logits_ref : (TILE_N, C)  f32/bf16 VMEM  (row-major block, contiguous DMA)
    # targets_ref: (1, TILE_N)  i32      VMEM
    # out_ref    : (1, 1, 128)  f32      VMEM  (per-core focal-loss sum)
    # acc_ref    : (1, TILE_N)  f32      VMEM  scratch (per-lane partial sums)
    ci = pl.program_id(0)                 # core axis ("parallel")
    ti = pl.program_id(1)                 # tile axis ("arbitrary", reduction)
    tiles_per_core = pl.num_programs(1)

    tile_n, num_classes = logits_ref.shape

    @pl.when(ti == 0)
    def _():
        acc_ref[...] = jnp.zeros_like(acc_ref)

    # In-kernel transpose to class-major (C, TILE_N): samples land on lanes so
    # exp / compare / select run at full 128-lane occupancy and the class
    # reductions are cheap sublane (XLU) reduces hidden under the DMA.
    x = jnp.transpose(logits_ref[...].astype(jnp.float32))      # (C, TILE_N)
    tgt = targets_ref[...]                                       # (1, TILE_N)

    # Numerically stable log-sum-exp over classes.
    col_max = jnp.max(x, axis=0, keepdims=True)                               # (1, TILE_N)
    lse = jnp.log(jnp.sum(jnp.exp(x - col_max), axis=0, keepdims=True)) + col_max

    # Target logit via one-hot select (no cross-lane gather).
    class_idx = jax.lax.broadcasted_iota(jnp.int32, (num_classes, tile_n), 0)
    onehot = class_idx == tgt                                                 # (C, TILE_N)
    x_t = jnp.sum(jnp.where(onehot, x, 0.0), axis=0, keepdims=True)           # (1, TILE_N)

    # Per-sample CE and focal modulation (gamma == 2 -> explicit square).
    ce = jnp.maximum(lse - x_t, 0.0)       # clamp guards tiny negative rounding
    pt = jnp.exp(-ce)
    q = 1.0 - pt
    fl = ALPHA * (q * q) * ce                                                 # (1, TILE_N)

    # Mask ragged / out-of-range lanes BEFORE accumulating (padded HBM reads may
    # contain garbage; the select produces 0 even if fl is NaN/inf there).
    base = (ci * tiles_per_core + ti) * tile_n
    lane = jax.lax.broadcasted_iota(jnp.int32, (1, tile_n), 1)
    valid = (base + lane) < n_valid
    fl = jnp.where(valid, fl, 0.0)

    # Per-lane partial sums: pure VPU adds, no per-step cross-lane reduce/store.
    acc_ref[...] += fl

    # Single cross-lane reduce + store per core, at the last tile.
    @pl.when(ti == tiles_per_core - 1)
    def _():
        out_ref[...] = jnp.broadcast_to(jnp.sum(acc_ref[...]), out_ref.shape)


def focal_loss(logits, targets, *, tile_n=None, num_cores=None):
    """logits: (N, C) float32/bfloat16 row-major (passed as-is, no transpose/pad);
    targets: (N,) int class indices.  Returns the mean focal loss (f32 scalar)."""
    # TODO(synk): PyTorch F.cross_entropy honors ignore_index=-100; targets are
    # assumed to be valid class indices here.
    n, num_classes = logits.shape

    dev_cores, dev_tile, vmem_limit = _device_defaults(num_classes)
    if num_cores is None:
        num_cores = dev_cores
    if tile_n is None:
        tile_n = dev_tile

    # Lane-dense tile over N: multiple of 128, never bigger than the rounded-up
    # per-core share (tiny N -> one exact block per core).
    tile_n = max(128, min(_round_up(tile_n, 128),
                          _round_up(pl.cdiv(n, num_cores), 128)))
    tiles_per_core = pl.cdiv(n, num_cores * tile_n)
    # Never hand a core zero in-bounds rows (avoid an all-out-of-bounds core).
    if num_cores > 1 and (num_cores - 1) * tiles_per_core * tile_n >= n:
        num_cores = 1
        tile_n = max(128, min(_round_up(dev_tile, 128), _round_up(n, 128)))
        tiles_per_core = pl.cdiv(n, tile_n)

    last_block = pl.cdiv(n, tile_n) - 1     # last row-block that touches real data

    # Targets as a (1, N) lane row (metadata-only reshape, no HBM pass).
    targets_row = targets.astype(jnp.int32).reshape(1, n)

    def logits_map(ci, ti):
        # Clamp so trailing grid steps past the data never issue an OOB DMA;
        # their lanes are zeroed by the validity mask inside the kernel.
        return (jnp.minimum(ci * tiles_per_core + ti, last_block), 0)

    def targets_map(ci, ti):
        return (0, jnp.minimum(ci * tiles_per_core + ti, last_block))

    grid_spec = pltpu.PrefetchScalarGridSpec(
        num_scalar_prefetch=0,
        grid=(num_cores, tiles_per_core),
        in_specs=[
            pl.BlockSpec((tile_n, num_classes), logits_map),
            pl.BlockSpec((1, tile_n), targets_map),
        ],
        out_specs=pl.BlockSpec((1, 1, 128), lambda ci, ti: (ci, 0, 0)),
        scratch_shapes=[pltpu.VMEM((1, tile_n), jnp.float32)],
    )

    out = pl.pallas_call(
        partial(focal_loss_kernel, n_valid=n),
        out_shape=jax.ShapeDtypeStruct((num_cores, 1, 128), jnp.float32),
        grid_spec=grid_spec,
        compiler_params=pltpu.CompilerParams(
            # TODO(synk): on v7x, pltpu.CORE_PARALLEL on the core axis may be
            # required to guarantee both TensorCores run; "parallel" is the
            # portable choice that compiles on all generations.
            dimension_semantics=("parallel", "arbitrary"),
            vmem_limit_bytes=vmem_limit),
    )(logits, targets_row)

    # Per-core partial sums -> mean.
    return jnp.sum(out[:, 0, 0]) / jnp.float32(n)


def focal_loss_ref(logits, targets):
    # Pure-JAX reference mirroring F.cross_entropy + focal modulation.
    logp = jax.nn.log_softmax(logits.astype(jnp.float32), axis=-1)
    ce = -jnp.take_along_axis(logp, targets[:, None].astype(jnp.int32), axis=-1)[:, 0]
    pt = jnp.exp(-ce)
    q = 1.0 - pt
    return jnp.mean(ALPHA * (q * q) * ce)


if __name__ == "__main__":
    key = jax.random.PRNGKey(0)
    k1, k2 = jax.random.split(key)

    N, C = 128, 16  # small shapes: 128 samples, 16 classes
    logits = jax.random.normal(k1, (N, C), dtype=jnp.float32)
    targets = jax.random.randint(k2, (N,), 0, C, dtype=jnp.int32)

    loss = focal_loss(logits, targets)
    jax.block_until_ready(loss)

    ref = focal_loss_ref(logits, targets)
    assert jnp.allclose(loss, ref, rtol=1e-5, atol=1e-6), (loss, ref)

    print("KERNEL_OK")
</pallas_src>

<mosaic_0001>
module attributes {stable_mosaic.version = 11 : i64} {
  func.func @focal_loss_kernel(%arg0: i32, %arg1: i32, %arg2: memref<128x16xf32, #tpu.memory_space<vmem>>, %arg3: memref<1x128xi32, #tpu.memory_space<vmem>>, %arg4: memref<1x1x128xf32, #tpu.memory_space<vmem>>, %arg5: memref<1x128xf32, #tpu.memory_space<vmem>>) attributes {dimension_semantics = [#tpu.dimension_semantics<parallel>, #tpu.dimension_semantics<arbitrary>], iteration_bounds = array<i64: 1, 1>, scalar_prefetch = 0 : i64, scratch_operands = 1 : i64, tpu.core_type = #tpu.core_type<tc>, window_params = [{transform_indices = @transform_0, window_bounds = array<i64: 128, 16>}, {transform_indices = @transform_1, window_bounds = array<i64: 1, 128>}, {transform_indices = @transform_2, window_bounds = array<i64: 1, 1, 128>}]} {
    %c0_i32 = arith.constant 0 : i32
    %0 = arith.cmpi eq, %arg1, %c0_i32 : i32
    %1 = arith.extui %0 : i1 to i32
    %c0_i32_0 = arith.constant 0 : i32
    %2 = arith.cmpi ne, %1, %c0_i32_0 : i32
    scf.if %2 {
      %cst_19 = arith.constant 0.000000e+00 : f32
      %50 = vector.broadcast %cst_19 : f32 to vector<1x128xf32>
      %c0_20 = arith.constant 0 : index
      %c0_21 = arith.constant 0 : index
      %51 = vector.load %arg5[%c0_20, %c0_21] : memref<1x128xf32, #tpu.memory_space<vmem>>, vector<1x128xf32>
      tpu.vector_store %arg5[%c0_20, %c0_21], %50 {strides = array<i32>} : memref<1x128xf32, #tpu.memory_space<vmem>>, vector<1x128xf32>,
    } else {
    }
    %c0 = arith.constant 0 : index
    %c0_1 = arith.constant 0 : index
    %3 = vector.load %arg2[%c0, %c0_1] : memref<128x16xf32, #tpu.memory_space<vmem>>, vector<128x16xf32>
    %4 = tpu.transpose %3, [1, 0] : vector<128x16xf32> -> vector<16x128xf32>
    %c0_2 = arith.constant 0 : index
    %c0_3 = arith.constant 0 : index
    %5 = vector.load %arg3[%c0_2, %c0_3] : memref<1x128xi32, #tpu.memory_space<vmem>>, vector<1x128xi32>
    %cst = arith.constant dense<0xFF800000> : vector<128xf32>
    %6 = vector.multi_reduction <maximumf>, %4, %cst [0] : vector<16x128xf32> to vector<128xf32>
    %7 = vector.shape_cast %6 : vector<128xf32> to vector<1x128xf32>
    %8 = vector.broadcast %7 : vector<1x128xf32> to vector<16x128xf32>
    %9 = arith.subf %4, %8 : vector<16x128xf32>
    %10 = math.exp %9 : vector<16x128xf32>
    %cst_4 = arith.constant dense<0.000000e+00> : vector<128xf32>
    %11 = vector.multi_reduction <add>, %10, %cst_4 [0] : vector<16x128xf32> to vector<128xf32>
    %12 = vector.shape_cast %11 : vector<128xf32> to vector<1x128xf32>
    %13 = math.log %12 : vector<1x128xf32>
    %14 = arith.addf %13, %7 : vector<1x128xf32>
    %15 = tpu.iota {dimensions = array<i32: 0>} : vector<16x128xi32>
    %16 = vector.broadcast %5 : vector<1x128xi32> to vector<16x128xi32>
    %17 = arith.cmpi eq, %15, %16 : vector<16x128xi32>
    %cst_5 = arith.constant 0.000000e+00 : f32
    %18 = vector.broadcast %cst_5 : f32 to vector<16x128xf32>
    %19 = arith.select %17, %4, %18 : vector<16x128xi1>, vector<16x128xf32>
    %cst_6 = arith.constant dense<0.000000e+00> : vector<128xf32>
    %20 = vector.multi_reduction <add>, %19, %cst_6 [0] : vector<16x128xf32> to vector<128xf32>
    %21 = vector.shape_cast %20 : vector<128xf32> to vector<1x128xf32>
    %22 = arith.subf %14, %21 : vector<1x128xf32>
    %cst_7 = arith.constant 0.000000e+00 : f32
    %23 = vector.broadcast %cst_7 : f32 to vector<1x128xf32>
    %24 = arith.maximumf %22, %23 : vector<1x128xf32>
    %cst_8 = arith.constant 0.000000e+00 : f32
    %25 = vector.broadcast %cst_8 : f32 to vector<1x128xf32>
    %26 = arith.subf %25, %24 : vector<1x128xf32>
    %27 = math.exp %26 : vector<1x128xf32>
    %cst_9 = arith.constant 1.000000e+00 : f32
    %28 = vector.broadcast %cst_9 : f32 to vector<1x128xf32>
    %29 = arith.subf %28, %27 : vector<1x128xf32>
    %30 = arith.mulf %29, %29 : vector<1x128xf32>
    %cst_10 = arith.constant 2.500000e-01 : f32
    %31 = vector.broadcast %cst_10 : f32 to vector<1x128xf32>
    %32 = arith.mulf %31, %30 : vector<1x128xf32>
    %33 = arith.mulf %32, %24 : vector<1x128xf32>
    %c1_i32 = arith.constant 1 : i32
    %34 = arith.muli %arg0, %c1_i32 : i32
    %35 = arith.addi %34, %arg1 : i32
    %c128_i32 = arith.constant 128 : i32
    %36 = arith.muli %35, %c128_i32 : i32
    %37 = tpu.iota {dimensions = array<i32: 1>} : vector<1x128xi32>
    %38 = vector.broadcast %36 : i32 to vector<1x128xi32>
    %39 = arith.addi %38, %37 : vector<1x128xi32>
    %c128_i32_11 = arith.constant 128 : i32
    %40 = vector.broadcast %c128_i32_11 : i32 to vector<1x128xi32>
    %41 = arith.cmpi slt, %39, %40 : vector<1x128xi32>
    %cst_12 = arith.constant 0.000000e+00 : f32
    %42 = vector.broadcast %cst_12 : f32 to vector<1x128xf32>
    %43 = arith.select %41, %33, %42 : vector<1x128xi1>, vector<1x128xf32>
    %c0_13 = arith.constant 0 : index
    %c0_14 = arith.constant 0 : index
    %44 = vector.load %arg5[%c0_13, %c0_14] : memref<1x128xf32, #tpu.memory_space<vmem>>, vector<1x128xf32>
    %45 = arith.addf %44, %43 : vector<1x128xf32>
    %c0_15 = arith.constant 0 : index
    %c0_16 = arith.constant 0 : index
    %46 = vector.load %arg5[%c0_15, %c0_16] : memref<1x128xf32, #tpu.memory_space<vmem>>, vector<1x128xf32>
    tpu.vector_store %arg5[%c0_15, %c0_16], %45 {strides = array<i32>} : memref<1x128xf32, #tpu.memory_space<vmem>>, vector<1x128xf32>,
    %c0_i32_17 = arith.constant 0 : i32
    %47 = arith.cmpi eq, %arg1, %c0_i32_17 : i32
    %48 = arith.extui %47 : i1 to i32
    %c0_i32_18 = arith.constant 0 : i32
    %49 = arith.cmpi ne, %48, %c0_i32_18 : i32
    scf.if %49 {
      %c0_19 = arith.constant 0 : index
      %c0_20 = arith.constant 0 : index
      %50 = vector.load %arg5[%c0_19, %c0_20] : memref<1x128xf32, #tpu.memory_space<vmem>>, vector<1x128xf32>
      %51 = vector.shape_cast %50 : vector<1x128xf32> to vector<1x1x128xf32>
      %cst_21 = arith.constant dense<0.000000e+00> : vector<1xf32>
      %52 = vector.multi_reduction <add>, %51, %cst_21 [1, 2] : vector<1x1x128xf32> to vector<1xf32>
      %53 = vector.shape_cast %52 : vector<1xf32> to vector<1x1x1xf32>
      %54 = vector.extract %53[0, 0, 0] : f32 from vector<1x1x1xf32>
      %55 = vector.broadcast %54 : f32 to vector<1x1x128xf32>
      %c0_22 = arith.constant 0 : index
      %c0_23 = arith.constant 0 : index
      %c0_24 = arith.constant 0 : index
      %56 = vector.load %arg4[%c0_22, %c0_23, %c0_24] : memref<1x1x128xf32, #tpu.memory_space<vmem>>, vector<1x1x128xf32>
      tpu.vector_store %arg4[%c0_22, %c0_23, %c0_24], %55 {strides = array<i32>} : memref<1x1x128xf32, #tpu.memory_space<vmem>>, vector<1x1x128xf32>,
    } else {
    }
    return
  }
  func.func @transform_0(%arg0: i32, %arg1: i32) -> (i32, i32) {
    %c1_i32 = arith.constant 1 : i32
    %0 = arith.muli %arg0, %c1_i32 : i32
    %1 = arith.addi %0, %arg1 : i32
    %c0_i32 = arith.constant 0 : i32
    %2 = arith.minsi %1, %c0_i32 : i32
    %c0_i32_0 = arith.constant 0 : i32
    %c0_i32_1 = arith.constant 0 : i32
    return %2, %c0_i32_0 : i32, i32
  }
  func.func @transform_1(%arg0: i32, %arg1: i32) -> (i32, i32) {
    %c1_i32 = arith.constant 1 : i32
    %0 = arith.muli %arg0, %c1_i32 : i32
    %1 = arith.addi %0, %arg1 : i32
    %c0_i32 = arith.constant 0 : i32
    %2 = arith.minsi %1, %c0_i32 : i32
    %c0_i32_0 = arith.constant 0 : i32
    %c0_i32_1 = arith.constant 0 : i32
    return %c0_i32_0, %2 : i32, i32
  }
  func.func @transform_2(%arg0: i32, %arg1: i32) -> (i32, i32, i32) {
    %c0_i32 = arith.constant 0 : i32
    %c0_i32_0 = arith.constant 0 : i32
    %c0_i32_1 = arith.constant 0 : i32
    return %arg0, %c0_i32, %c0_i32_0 : i32, i32, i32
  }
}

</mosaic_0001>

<bundles_post_ra>
// kernel: tpu_custom_call.1
= control target key start
LH: loop header
LB: loop body
LE: loop exit
PB: predicated region body
PF: predicated region fallthrough
CT: control target
= control target key end

     0   :  { %s332_s0 = inlined_call_operand.vmem [shape: f32[128,16], index: 0, kind: input, shape index: {}]   ;;  %s333_s1 = inlined_call_operand.vmem [shape: s32[1,128], index: 1, kind: input, shape index: {}]   ;;  %s334_s2 = inlined_call_operand.hbm [shape: f32[1,1,128], index: 2, kind: output, shape index: {}]  }
   0x1   :  { %v73_v0 = vld [vmem:[%s332_s0] sm:$0xff] }
   0x2   :  { %89 = vxpose.xlu0.b32.start [1/16] (narrow) %v73_v0, 16 }
   0x3   :  { %7 = vsyncpa [#allocation4], 0  ;;  %v74_v1 = vld [vmem:[%s332_s0 + $0x8] sm:$0xff]  ;;  %v75_v2 = vld [vmem:[%s332_s0 + $0x10] sm:$0xff]  ;;  %v261_v16 = vmov 0.0   ;;  %v145_v24 = vlaneseq  ;;  %vm184_vm2 = vcmask 1040384  }
   0x4   :  { %v76_v3 = vld [vmem:[%s332_s0 + $0x18] sm:$0xff]  ;;  %v77_v4 = vld [vmem:[%s332_s0 + $0x20] sm:$0xff]  ;;  %v78_v5 = vld [vmem:[%s332_s0 + $0x28] sm:$0xff]  ;;  %72 = vst [vmem:[#allocation2] sm:$0x1] %v261_v16  ;;  %s204_s17 = sshll.u32 %s334_s2, 4  ;;  %s205_s17 = int_to_ptr.hbm [resolvable:$true] %s204_s17 }
   0x5   :  { %v79_v6 = vld [vmem:[%s332_s0 + $0x30] sm:$0xff]  ;;  %v80_v7 = vld [vmem:[%s332_s0 + $0x38] sm:$0xff]  ;;  %v81_v8 = vld [vmem:[%s332_s0 + $0x40] sm:$0xff]  ;;  %v146_v27 = vshrl.u32 %v145_v24, 7 }
   0x6   :  { %v82_v9 = vld [vmem:[%s332_s0 + $0x48] sm:$0xff]  ;;  %v83_v10 = vld [vmem:[%s332_s0 + $0x50] sm:$0xff]  ;;  %v84_v11 = vld [vmem:[%s332_s0 + $0x58] sm:$0xff] }
   0x7   :  { %v85_v12 = vld [vmem:[%s332_s0 + $0x60] sm:$0xff]  ;;  %v86_v13 = vld [vmem:[%s332_s0 + $0x68] sm:$0xff]  ;;  %v87_v14 = vld [vmem:[%s332_s0 + $0x70] sm:$0xff]  ;;  %v147_v30 = vadd.s32 8, %v146_v27 }
   0x8   :  { %v88_v15 = vld [vmem:[%s332_s0 + $0x78] sm:$0xff]  ;;  %v226_v33 = vld [vmem:[%s333_s1] ss:$0 sm:$0xff]  ;;  %s262_s1 = smov [#allocation3]  }
   0x9   :  { %vm150_vm0 = vcmp.eq.s32.totalorder %v147_v30, %v226_v33  ;;  %vm149_vm1 = vcmp.eq.s32.totalorder %v146_v27, %v226_v33  ;;  %s202_s14 = sshll.u32 %s262_s1, 4  ;;  %s203_s14 = int_to_ptr.vmem [resolvable:$true] %s202_s14 }
   0xa   :  { %90 = vxpose.xlu0.b32.cont [2/16] (narrow) %v74_v1, 16 }
   0xb   :  { %v177_v63 = vld [vmem:[#allocation2] sm:$0x1] }
  0x12   :  { %91 = vxpose.xlu0.b32.cont [3/16] (narrow) %v75_v2, 16 }
  0x1a   :  { %92 = vxpose.xlu0.b32.cont [4/16] (narrow) %v76_v3, 16 }
  0x22   :  { %93 = vxpose.xlu0.b32.cont [5/16] (narrow) %v77_v4, 16 }
  0x2a   :  { %94 = vxpose.xlu0.b32.cont [6/16] (narrow) %v78_v5, 16 }
  0x32   :  { %95 = vxpose.xlu0.b32.cont [7/16] (narrow) %v79_v6, 16 }
  0x3a   :  { %96 = vxpose.xlu0.b32.cont [8/16] (narrow) %v80_v7, 16 }
  0x42   :  { %97 = vxpose.xlu0.b32.cont [9/16] (narrow) %v81_v8, 16 }
  0x4a   :  { %98 = vxpose.xlu0.b32.cont [10/16] (narrow) %v82_v9, 16 }
  0x52   :  { %99 = vxpose.xlu0.b32.cont [11/16] (narrow) %v83_v10, 16 }
  0x5a   :  { %100 = vxpose.xlu0.b32.cont [12/16] (narrow) %v84_v11, 16 }
  0x62   :  { %101 = vxpose.xlu0.b32.cont [13/16] (narrow) %v85_v12, 16 }
  0x6a   :  { %102 = vxpose.xlu0.b32.cont [14/16] (narrow) %v86_v13, 16 }
  0x72   :  { %103 = vxpose.xlu0.b32.cont [15/16] (narrow) %v87_v14, 16 }
  0x7a   :  { %104 = vxpose.xlu0.b32.end [16/16] (narrow) %v88_v15, 16 }
  0xa6   :  { %v105_v17 = vpop.trf.xlu0 }
  0xa7   :  { %v151_v36 = vsel %vm149_vm1, %v105_v17, 0.0 }
  0xae   :  { %v106_v18 = vpop.trf.xlu0 }
  0xaf   :  { %v122_v19 = vmax.f32 %v105_v17, %v106_v18  ;;  %v152_v34 = vsel %vm150_vm0, %v106_v18, 0.0 }
  0xb0   :  { %v153_v38 = vadd.f32 %v152_v34, %v151_v36 }
  0xb1   :  { %v123_v20 = vrot.slane %v122_v19, 4 }
  0xb2   :  { %v154_v41 = vrot.slane %v153_v38, 4 }
  0xb3   :  { %v124_v21 = vmax.f32 %v122_v19, %v123_v20 }
  0xb4   :  { %v155_v44 = vadd.f32 %v154_v41, %v153_v38 }
  0xb5   :  { %v125_v22 = vrot.slane %v124_v21, 2 }
  0xb6   :  { %v156_v47 = vrot.slane %v155_v44, 2 }
  0xb7   :  { %v126_v23 = vmax.f32 %v124_v21, %v125_v22 }
  0xb8   :  { %v157_v49 = vadd.f32 %v156_v47, %v155_v44 }
  0xb9   :  { %v127_v25 = vrot.slane %v126_v23, 1 }
  0xba   :  { %v158_v50 = vrot.slane %v157_v49, 1 }
  0xbb   :  { %v128_v26 = vmax.f32 %v126_v23, %v127_v25 }
  0xbc   :  { %v159_v54 = vadd.f32 %v158_v50, %v157_v49 }
  0xbd   :  { %v129_v28 = vsub.f32 %v105_v17, %v128_v26  ;;  %v130_v29 = vsub.f32 %v106_v18, %v128_v26 }
  0xbf   :  { %v131_v31 = vmul.f32 1.442695, %v129_v28  ;;  %v133_v32 = vmul.f32 1.442695, %v130_v29 }
  0xc1   :  { %227 = vpow2.f32 %v131_v31 }
  0xc2   :  { %229 = vpow2.f32 %v133_v32 }
  0xc7   :  { %v228_v35 = vpop.eup %227 }
  0xc8   :  { %v230_v37 = vpop.eup %229 }
  0xc9   :  { %v135_v39 = vadd.f32 %v230_v37, %v228_v35 }
  0xcb   :  { %v136_v40 = vrot.slane %v135_v39, 4 }
  0xcd   :  { %v137_v42 = vadd.f32 %v136_v40, %v135_v39 }
  0xcf   :  { %v138_v43 = vrot.slane %v137_v42, 2 }
  0xd1   :  { %v139_v45 = vadd.f32 %v138_v43, %v137_v42 }
  0xd3   :  { %v140_v46 = vrot.slane %v139_v45, 1 }
  0xd5   :  { %v141_v48 = vadd.f32 %v140_v46, %v139_v45 }
  0xd7   :  { %231 = vlog2.f32 %v141_v48 }
  0xdd   :  { %v232_v51 = vpop.eup %231 }
  0xde   :  { %v143_v52 = vmul.f32 0.6931472, %v232_v51 }
  0xe0   :  { %v144_v53 = vadd.f32 %v143_v52, %v128_v26 }
  0xe2   :  { %v160_v55 = vsub.f32 %v144_v53, %v159_v54 }
  0xe4   :  { %v161_v56 = vmax.f32 %v160_v55, 0.0 }
  0xe6   :  { %v162_v57 = vsub.f32 0.0, %v161_v56 }
  0xe8   :  { %v163_v58 = vmul.f32 1.442695, %v162_v57 }
  0xea   :  { %233 = vpow2.f32 %v163_v58 }
  0xf0   :  { %v234_v59 = vpop.eup %233 }
  0xf1   :  { %v165_v60 = vsub.f32 1.0, %v234_v59 }
  0xf3   :  { %v166_v61 = vmul.f32 %v165_v60, %v165_v60 }
  0xf5   :  { %v167_v62 = vmul.f32 0.25, %v166_v61 }
  0xf7   :  { %v168_v0 = vmul.f32 %v167_v62, %v161_v56 }
  0xf9   :  { %v178_v1 = vadd.f32 %v177_v63, %v168_v0 }
  0xfb   :  { %179 = vst [vmem:[#allocation2] sm:$0x1] %v178_v1 }
 0x102   :  { %v183_v2 = vld [vmem:[#allocation2] sm:$0x1] }
 0x103   :  { %v185_v3 = vsel %vm184_vm2, %v183_v2, 0.0 }
 0x104   :  { %186 = vadd.xlane.f32.xlu1 %v185_v3 }
 0x177   :  { %v187_v4 = vpop.xlane.xlu1 %186 }
 0x178   :  { %v188_v5 = vrot.slane %v187_v4, 4 }
 0x17a   :  { %v189_v6 = vadd.f32 %v188_v5, %v187_v4 }
 0x17c   :  { %v190_v7 = vrot.slane %v189_v6, 2 }
 0x17e   :  { %v191_v8 = vadd.f32 %v190_v7, %v189_v6 }
 0x180   :  { %v192_v9 = vrot.slane %v191_v8, 1 }
 0x182   :  { %v193_v10 = vadd.f32 %v192_v9, %v191_v8 }
 0x184   :  { %222 = vpush %v193_v10 }
 0x1b5   :  { %s223_s18 = spop %222 }
 0x1b6   :  { %v195_v11 = vstv %s223_s18 }
 0x1b7   :  { %196 = vst [vmem:[#allocation3] sm:$0x1] %v195_v11 }
 0x1b8   :  { %207 = dma.vmem_to_hbm [thread:$0]  %s203_s14, 16, %s205_s17, [#allocation4]  }
 0x1b9   :  { %259 = dma.done.wait [#allocation4], 16  }
 0x1ba   :  { %260 = vsyncadd [#allocation4], 4294967280 }
 0x1bb   :  { %212 = vsyncpa [#allocation4], 1 }

</bundles_post_ra>
